<compile_context>
chip_gen: v7x
topology: tpu7x:2x2x1
jax: 0.10.0
libtpu: 0.0.40
codegen_flags: <defaults>
</compile_context>

<pallas_src>
import jax
import jax.numpy as jnp
from jax.experimental import pallas as pl
from jax.experimental.pallas import tpu as pltpu

_MAX_ATOM_TYPE = 86
_LANE = 128
_VMEM_BUDGET_BYTES = 48 * 1024 * 1024   # stay well under v7x's 64 MiB physical


def _round_up(x, m):
    return ((x + m - 1) // m) * m


# ----------------------------------------------------------------------------
# Minimal irreps bookkeeping (replaces e3nn.o3.Irreps for this synthetic run).
# irreps list: [(mul, (l, p)), ...], ir.dim = 2*l + 1.
# ----------------------------------------------------------------------------
def _irreps_dims(irreps):
    return [mul * (2 * l + 1) for mul, (l, p) in irreps]


def build_scalar_mask(irreps):
    """Boolean mask over output channels: True where the irrep is 0e."""
    mask = []
    for mul, (l, p) in irreps:
        dim = mul * (2 * l + 1)
        mask.extend([(l == 0 and p == 1)] * dim)
    return jnp.asarray(mask, dtype=bool)


# ----------------------------------------------------------------------------
# Pallas kernel: one-hot + linear, one lane-dense full-tile store per output.
# ----------------------------------------------------------------------------
def node_embedding_kernel(atom_ref, w_ref, b_ref, onehot_ref, emb_ref):
    rows = atom_ref.shape[0]
    k_pad = onehot_ref.shape[1]                                   # 128-padded

    atom = atom_ref[...]                                          # (rows, 1) i32
    col = jax.lax.broadcasted_iota(jnp.int32, (rows, k_pad), 1)
    onehot = col == atom                                          # bool, cols>=86 never hit
    onehot_ref[...] = onehot.astype(onehot_ref.dtype)             # unmasked vst

    w = w_ref[...]                                                # (k_pad, d_pad)
    emb = jnp.dot(onehot.astype(w.dtype), w,
                  preferred_element_type=jnp.float32)
    emb = emb + b_ref[...].astype(jnp.float32)
    emb_ref[...] = emb.astype(emb_ref.dtype)                      # unmasked vst


def node_embedding_forward(node_atom, weight, bias, *, row_block=8192,
                           onehot_dtype=None, trim=True):
    """node_atom: (N,) int; weight: (max_atom_type, D); bias: (D,).

    Returns (node_embedding, node_attr, node_atom_onehot).
    trim=True  -> exact PyTorch-module shapes (N, D) / (N, max_atom_type).
    trim=False -> padded slabs (N_pad, 128-rounded dims) for fused consumers;
                  padded rows have all-zero one-hot and emb == bias.
    Weight/bias are expected in f32/bf16 (the MXU operand uses weight dtype).
    """
    n = int(node_atom.shape[0])
    max_atom_type, d_out = weight.shape
    out_dtype = weight.dtype
    onehot_dtype = out_dtype if onehot_dtype is None else jnp.dtype(onehot_dtype)

    k_pad = _round_up(max_atom_type, _LANE)
    d_pad = _round_up(d_out, _LANE)

    # Sublane granularity from the narrowest stored output dtype.
    min_item = min(jnp.dtype(out_dtype).itemsize, jnp.dtype(onehot_dtype).itemsize)
    sub = max(8, 32 // min_item)

    row_block = max(sub, _round_up(min(row_block, n), sub))

    # Explicit VMEM budget: 2x double-buffered tiles (atom tile lane-pads to 128).
    def vmem_bytes(rb):
        atom_t = rb * _LANE * 4
        onehot_t = rb * k_pad * jnp.dtype(onehot_dtype).itemsize
        emb_t = rb * d_pad * jnp.dtype(out_dtype).itemsize
        w_t = k_pad * d_pad * jnp.dtype(weight.dtype).itemsize
        b_t = 8 * d_pad * jnp.dtype(bias.dtype).itemsize
        return 2 * (atom_t + onehot_t + emb_t + w_t + b_t)

    while row_block > sub and vmem_bytes(row_block) > _VMEM_BUDGET_BYTES:
        row_block = max(sub, _round_up(row_block // 2, sub))

    n_pad = row_block * pl.cdiv(n, row_block)

    atom = node_atom.astype(jnp.int32).reshape(n, 1)
    if n_pad != n:
        # -1 never matches any column -> zero one-hot row, emb row == bias.
        atom = jnp.pad(atom, ((0, n_pad - n), (0, 0)), constant_values=-1)

    # Zero-pad weight/bias to lane-dense (k_pad, d_pad) once, host-side.
    w_p = jnp.zeros((k_pad, d_pad), weight.dtype).at[:max_atom_type, :d_out].set(weight)
    b_p = jnp.zeros((1, d_pad), bias.dtype).at[0, :d_out].set(bias)

    onehot, emb = pl.pallas_call(
        node_embedding_kernel,
        out_shape=(
            jax.ShapeDtypeStruct((n_pad, k_pad), onehot_dtype),
            jax.ShapeDtypeStruct((n_pad, d_pad), out_dtype),
        ),
        grid_spec=pltpu.PrefetchScalarGridSpec(
            num_scalar_prefetch=0,
            grid=(n_pad // row_block,),
            in_specs=[
                pl.BlockSpec((row_block, 1), lambda i: (i, 0)),
                pl.BlockSpec((k_pad, d_pad), lambda i: (0, 0)),
                pl.BlockSpec((1, d_pad), lambda i: (0, 0)),
            ],
            out_specs=[
                pl.BlockSpec((row_block, k_pad), lambda i: (i, 0)),
                pl.BlockSpec((row_block, d_pad), lambda i: (i, 0)),
            ],
        ),
        compiler_params=pltpu.CompilerParams(
            dimension_semantics=("parallel",),
            vmem_limit_bytes=vmem_bytes(row_block) + (2 << 20),
        ),
    )(atom, w_p, b_p)

    if trim:
        onehot = onehot[:n, :max_atom_type]
        emb = emb[:n, :d_out]
    return emb, onehot, onehot


# Pure-JAX reference mirroring the PyTorch forward.
def node_embedding_reference(node_atom, weight, bias):
    onehot = jax.nn.one_hot(node_atom, weight.shape[0], dtype=weight.dtype)
    emb = onehot @ weight + bias
    return emb, onehot, onehot


if __name__ == "__main__":
    max_atom_type = _MAX_ATOM_TYPE
    # irreps_node_embedding = "32x0e + 16x1o + 8x2e" -> dim = 32 + 48 + 40 = 120
    irreps_node_embedding = [(32, (0, 1)), (16, (1, -1)), (8, (2, 1))]
    d_out = sum(_irreps_dims(irreps_node_embedding))
    scalar_mask = build_scalar_mask(irreps_node_embedding)

    key = jax.random.PRNGKey(0)
    k_atom, k_w, k_b = jax.random.split(key, 3)
    n_nodes = 16
    node_atom = jax.random.randint(k_atom, (n_nodes,), 0, max_atom_type,
                                   dtype=jnp.int32)

    # Effective LinearRS weight/bias: only 0e output channels connected to the
    # 86x0e input; sqrt(max_atom_type) init rescale folded in.
    w_raw = jax.random.normal(k_w, (max_atom_type, d_out), dtype=jnp.float32)
    w_raw = w_raw * (max_atom_type ** 0.5) / max_atom_type
    weight = jnp.where(scalar_mask[None, :], w_raw, 0.0)
    b_raw = jax.random.normal(k_b, (d_out,), dtype=jnp.float32)
    bias = jnp.where(scalar_mask, b_raw, 0.0)

    emb, attr, onehot = node_embedding_forward(node_atom, weight, bias)
    emb = jax.block_until_ready(emb)

    emb_ref, attr_ref, onehot_ref = node_embedding_reference(node_atom, weight, bias)
    assert emb.shape == (n_nodes, d_out), (emb.shape, d_out)
    assert onehot.shape == (n_nodes, max_atom_type)
    assert jnp.allclose(onehot, onehot_ref), "one-hot mismatch"
    assert jnp.allclose(attr, attr_ref), "node_attr mismatch"
    assert jnp.allclose(emb, emb_ref, atol=1e-5, rtol=1e-5), "embedding mismatch"

    print("KERNEL_OK")
</pallas_src>

<mosaic_0001>
module attributes {stable_mosaic.version = 11 : i64} {
  func.func @node_embedding_kernel(%arg0: i32, %arg1: memref<16x1xi32, #tpu.memory_space<vmem>>, %arg2: memref<128x128xf32, #tpu.memory_space<vmem>>, %arg3: memref<1x128xf32, #tpu.memory_space<vmem>>, %arg4: memref<16x128xf32, #tpu.memory_space<vmem>>, %arg5: memref<16x128xf32, #tpu.memory_space<vmem>>) attributes {dimension_semantics = [#tpu.dimension_semantics<parallel>], iteration_bounds = array<i64: 1>, scalar_prefetch = 0 : i64, scratch_operands = 0 : i64, tpu.core_type = #tpu.core_type<tc>, window_params = [{transform_indices = @transform_0, window_bounds = array<i64: 16, 1>}, {pipeline_mode = #tpu.pipeline_mode<synchronous>, transform_indices = @transform_1, window_bounds = array<i64: 128, 128>}, {pipeline_mode = #tpu.pipeline_mode<synchronous>, transform_indices = @transform_2, window_bounds = array<i64: 1, 128>}, {transform_indices = @transform_3, window_bounds = array<i64: 16, 128>}, {transform_indices = @transform_4, window_bounds = array<i64: 16, 128>}]} {
    %c0 = arith.constant 0 : index
    %c0_0 = arith.constant 0 : index
    %0 = vector.load %arg1[%c0, %c0_0] : memref<16x1xi32, #tpu.memory_space<vmem>>, vector<16x1xi32>
    %1 = tpu.iota {dimensions = array<i32: 1>} : vector<16x128xi32>
    %2 = vector.broadcast %0 : vector<16x1xi32> to vector<16x128xi32>
    %3 = arith.cmpi eq, %1, %2 : vector<16x128xi32>
    %4 = arith.extui %3 : vector<16x128xi1> to vector<16x128xi32>
    %5 = arith.sitofp %4 : vector<16x128xi32> to vector<16x128xf32>
    %c0_1 = arith.constant 0 : index
    %c0_2 = arith.constant 0 : index
    %6 = vector.load %arg4[%c0_1, %c0_2] : memref<16x128xf32, #tpu.memory_space<vmem>>, vector<16x128xf32>
    tpu.vector_store %arg4[%c0_1, %c0_2], %5 {strides = array<i32>} : memref<16x128xf32, #tpu.memory_space<vmem>>, vector<16x128xf32>,
    %c0_3 = arith.constant 0 : index
    %c0_4 = arith.constant 0 : index
    %7 = vector.load %arg2[%c0_3, %c0_4] : memref<128x128xf32, #tpu.memory_space<vmem>>, vector<128x128xf32>
    %8 = arith.extui %3 : vector<16x128xi1> to vector<16x128xi32>
    %9 = arith.sitofp %8 : vector<16x128xi32> to vector<16x128xf32>
    %cst = arith.constant dense<0.000000e+00> : vector<16x128xf32>
    %10 = tpu.matmul %9, %7, %cst {dimension_numbers = #tpu.dot_dimension_numbers<[1], [0], [0], [1], [0, 0, 1, 1], [], []>} : vector<16x128xf32>, vector<128x128xf32>, vector<16x128xf32> -> vector<16x128xf32>
    %c0_5 = arith.constant 0 : index
    %c0_6 = arith.constant 0 : index
    %11 = vector.load %arg3[%c0_5, %c0_6] : memref<1x128xf32, #tpu.memory_space<vmem>>, vector<1x128xf32>
    %12 = vector.broadcast %11 : vector<1x128xf32> to vector<16x128xf32>
    %13 = arith.addf %10, %12 : vector<16x128xf32>
    %c0_7 = arith.constant 0 : index
    %c0_8 = arith.constant 0 : index
    %14 = vector.load %arg5[%c0_7, %c0_8] : memref<16x128xf32, #tpu.memory_space<vmem>>, vector<16x128xf32>
    tpu.vector_store %arg5[%c0_7, %c0_8], %13 {strides = array<i32>} : memref<16x128xf32, #tpu.memory_space<vmem>>, vector<16x128xf32>,
    return
  }
  func.func @transform_0(%arg0: i32) -> (i32, i32) {
    %c0_i32 = arith.constant 0 : i32
    %c0_i32_0 = arith.constant 0 : i32
    return %arg0, %c0_i32 : i32, i32
  }
  func.func @transform_1(%arg0: i32) -> (i32, i32) {
    %c0_i32 = arith.constant 0 : i32
    %c0_i32_0 = arith.constant 0 : i32
    %c0_i32_1 = arith.constant 0 : i32
    return %c0_i32, %c0_i32_0 : i32, i32
  }
  func.func @transform_2(%arg0: i32) -> (i32, i32) {
    %c0_i32 = arith.constant 0 : i32
    %c0_i32_0 = arith.constant 0 : i32
    %c0_i32_1 = arith.constant 0 : i32
    return %c0_i32, %c0_i32_0 : i32, i32
  }
  func.func @transform_3(%arg0: i32) -> (i32, i32) {
    %c0_i32 = arith.constant 0 : i32
    %c0_i32_0 = arith.constant 0 : i32
    return %arg0, %c0_i32 : i32, i32
  }
  func.func @transform_4(%arg0: i32) -> (i32, i32) {
    %c0_i32 = arith.constant 0 : i32
    %c0_i32_0 = arith.constant 0 : i32
    return %arg0, %c0_i32 : i32, i32
  }
}

</mosaic_0001>

<bundles_post_ra>
// kernel: tpu_custom_call.1
= control target key start
LH: loop header
LB: loop body
LE: loop exit
PB: predicated region body
PF: predicated region fallthrough
CT: control target
= control target key end

     0   :  { %10 = vsyncpa [#allocation3], 0  ;;  %s441_s0 = inlined_call_operand.vmem [shape: s32[16,1], index: 0, kind: input, shape index: {}]   ;;  %s442_s1 = inlined_call_operand.hbm [shape: f32[128,128], index: 1, kind: input, shape index: {}]   ;;  %s443_s2 = inlined_call_operand.vmem [shape: f32[1,128], index: 2, kind: input, shape index: {}]   ;;  %s444_s3 = inlined_call_operand.hbm [shape: f32[16,128], index: 3, kind: output, shape index: {0}]   ;;  %s445_s4 = inlined_call_operand.hbm [shape: f32[16,128], index: 4, kind: output, shape index: {1}]  }
   0x1   :  { %11 = vsyncpa [#allocation4], 0 }
   0x2   :  { %12 = vsyncpa [#allocation7], 0  ;;  %s354_s15 = smov [#allocation2]   ;;  %s282_s19 = scalar_lea.hbm %s442_s1, 2048 }
   0x3   :  { %s20_s16 = sshll.u32 %s354_s15, 4  ;;  %p283_p0 = scmp.ne.s32.totalorder %s442_s1, %s282_s19  ;;  %s21_s16 = int_to_ptr.vmem [resolvable:$true] %s20_s16 }
   0x4   :  { %p286_p1 = scmp.lt.u32.totalorder %s282_s19, %s442_s1 }
   0x6   :  { %p288_p2 = pnand %p286_p1, %p283_p0 }
   0x8   :  { %291 = shalt.err (!%p288_p2)
}
   0x9   :  { %s292_s24 = scalar_lea.vmem %s21_s16, 2048  ;;  %p297_p4 = scmp.lt.s32.totalorder %s21_s16, %s21_s16 }
   0xa   :  { %p293_p3 = scmp.ne.s32.totalorder %s21_s16, %s292_s24  ;;  %p298_p5 = scmp.lt.s32.totalorder %s292_s24, %s292_s24 }
   0xc   :  { %p299_p6 = por %p298_p5, %p297_p4 }
   0xe   :  { %p300_p7 = pnand %p299_p6, %p293_p3 }
  0x10   :  { %303 = shalt.err (!%p300_p7)
}
  0x11   :  { %s355_s25 = smov 128   ;;  %s356_s26 = smov 8  }
  0x12   :  { %26 = dma.hbm_to_vmem [thread:$0]  %s442_s1, 2048, %s21_s16, [#allocation3], %s355_s25, %s355_s25, %s356_s26  }
  0x13   :  { %348 = dma.done.wait [#allocation3], 2048  }
  0x14   :  { %349 = vsyncadd [#allocation3], 4294965248  ;;  %v357_v0 = vmov 0   ;;  %v32_v1 = vld [vmem:[%s441_s0] sm:$0xff]  ;;  %v50_v2 = vld [vmem:[#allocation2] sm:$0xff]  ;;  %v34_v27 = vlaneseq  ;;  %v358_v30 = vmov 0.0  }
  0x15   :  { %281 = vset.pattern.permute.xlu0 %v357_v0  ;;  %v51_v3 = vld [vmem:[#allocation2 + $0x8] sm:$0xff]  ;;  %v52_v4 = vld [vmem:[#allocation2 + $0x10] sm:$0xff]  ;;  %v53_v5 = vld [vmem:[#allocation2 + $0x18] sm:$0xff]  ;;  %v359_v32 = vmov 1.0  }
  0x16   :  { %37 = vperm.xlu0 %281, %v32_v1   ;;  %v33_v6 = vld [vmem:[%s441_s0 + $0x8] sm:$0xff]  ;;  %v241_v7 = vpack.c.bf16 %v51_v3, %v50_v2  ;;  %v245_v8 = vpack.c.bf16 %v53_v5, %v52_v4  ;;  %v54_v9 = vld [vmem:[#allocation2 + $0x20] sm:$0xff]  ;;  %v55_v10 = vld [vmem:[#allocation2 + $0x28] sm:$0xff]  ;;  %v35_v28 = vand.u32 127, %v34_v27  ;;  %s360_s0 = smov [#allocation5]  }
  0x17   :  { %v249_v11 = vpack.c.bf16 %v55_v10, %v54_v9  ;;  %v56_v12 = vld [vmem:[#allocation2 + $0x30] sm:$0xff]  ;;  %v57_v13 = vld [vmem:[#allocation2 + $0x38] sm:$0xff]  ;;  %v58_v15 = vld [vmem:[#allocation2 + $0x40] sm:$0xff]  ;;  %s155_s1 = sshll.u32 %s360_s0, 4  ;;  %s156_s1 = int_to_ptr.vmem [resolvable:$true] %s155_s1 }
  0x18   :  { %242 = vmatprep.subr.bf16.mxu0 %v241_v7  ;;  %v253_v14 = vpack.c.bf16 %v57_v13, %v56_v12  ;;  %v59_v16 = vld [vmem:[#allocation2 + $0x48] sm:$0xff]  ;;  %v60_v18 = vld [vmem:[#allocation2 + $0x50] sm:$0xff]  ;;  %v61_v19 = vld [vmem:[#allocation2 + $0x58] sm:$0xff]  ;;  %s304_s7 = scalar_lea.vmem %s156_s1, 256  ;;  %p309_p9 = scmp.lt.s32.totalorder %s156_s1, %s156_s1 }
  0x19   :  { %244 = vmatpush3.bf16.msra.mxu0 %v241_v7  ;;  %v257_v17 = vpack.c.bf16 %v59_v16, %v58_v15  ;;  %v261_v20 = vpack.c.bf16 %v61_v19, %v60_v18  ;;  %v62_v21 = vld [vmem:[#allocation2 + $0x60] sm:$0xff]  ;;  %v63_v22 = vld [vmem:[#allocation2 + $0x68] sm:$0xff]  ;;  %v64_v24 = vld [vmem:[#allocation2 + $0x70] sm:$0xff]  ;;  %p305_p8 = scmp.ne.s32.totalorder %s156_s1, %s304_s7  ;;  %p310_p10 = scmp.lt.s32.totalorder %s304_s7, %s304_s7 }
  0x1a   :  { %40 = vperm.xlu0 %281, %v33_v6   ;;  %246 = vmatprep.subr.bf16.mxu0 %v245_v8  ;;  %v265_v23 = vpack.c.bf16 %v63_v22, %v62_v21  ;;  %v65_v25 = vld [vmem:[#allocation2 + $0x78] sm:$0xff] }
  0x1b   :  { %v269_v26 = vpack.c.bf16 %v65_v25, %v64_v24  ;;  %p311_p11 = por %p310_p10, %p309_p9 }
  0x1d   :  { %248 = vmatpush3.bf16.msra.mxu0 %v245_v8  ;;  %p312_p12 = pnand %p311_p11, %p305_p8 }
  0x1e   :  { %250 = vmatprep.subr.bf16.mxu0 %v249_v11 }
  0x21   :  { %252 = vmatpush3.bf16.msra.mxu0 %v249_v11 }
  0x22   :  { %254 = vmatprep.subr.bf16.mxu0 %v253_v14 }
  0x25   :  { %256 = vmatpush3.bf16.msra.mxu0 %v253_v14 }
  0x26   :  { %258 = vmatprep.subr.bf16.mxu0 %v257_v17 }
  0x29   :  { %260 = vmatpush3.bf16.msra.mxu0 %v257_v17 }
  0x2a   :  { %262 = vmatprep.subr.bf16.mxu0 %v261_v20 }
  0x2d   :  { %264 = vmatpush3.bf16.msra.mxu0 %v261_v20 }
  0x2e   :  { %266 = vmatprep.subr.bf16.mxu0 %v265_v23 }
  0x31   :  { %268 = vmatpush3.bf16.msra.mxu0 %v265_v23 }
  0x32   :  { %270 = vmatprep.subr.bf16.mxu0 %v269_v26 }
  0x35   :  { %272 = vmatpush3.bf16.msra.mxu0 %v269_v26 }
  0x95   :  { %v38_v29 = vpop.permute.xlu0 %37 }
  0x96   :  { %vm42_vm0 = vcmp.eq.s32.totalorder %v35_v28, %v38_v29 }
  0x97   :  { %v183_v31 = vsel %vm42_vm0, 1.0, %v358_v30  ;;  %238 = vmatprep.mubr.msk.f32.mxu0 %vm42_vm0, %v359_v32 }
  0x98   :  { %48 = vst [vmem:[#allocation5] sm:$0xff] %v183_v31 }
  0x99   :  { %v41_v33 = vpop.permute.xlu0 %40 }
  0x9a   :  { %vm43_vm1 = vcmp.eq.s32.totalorder %v35_v28, %v41_v33 }
  0x9b   :  { %v184_v34 = vsel %vm43_vm1, 1.0, %v358_v30  ;;  %239 = vmatmul.mubr.msk.f32.vlgmr.msra.gmra.mrb[0].mxu0 %vm43_vm1, %v359_v32 }
  0x9c   :  { %49 = vst [vmem:[#allocation5 + $0x8] sm:$0xff] %v184_v34 }
  0x9d   :  { %315 = shalt.err (!%p312_p12)
}
  0x9e   :  { %s316_s10 = scalar_lea.hbm %s444_s3, 256 }
  0x9f   :  { %p317_p13 = scmp.ne.s32.totalorder %s444_s3, %s316_s10  ;;  %p320_p0 = scmp.lt.u32.totalorder %s316_s10, %s444_s3 }
  0xa1   :  { %p322_p1 = pnand %p320_p0, %p317_p13 }
  0xa3   :  { %325 = shalt.err (!%p322_p1)
}
  0xa4   :  { %161 = dma.vmem_to_hbm [thread:$0]  %s156_s1, 256, %s444_s3, [#allocation4], %s355_s25, %s355_s25, %s356_s26  }
  0xa5   :  { %v185_v35 = vld [vmem:[%s443_s2] ss:$0 sm:$0xff]  ;;  %s361_s19 = smov [#allocation6]  }
  0xa6   :  { %s167_s20 = sshll.u32 %s361_s19, 4  ;;  %s168_s20 = int_to_ptr.vmem [resolvable:$true] %s167_s20 }
  0xa7   :  { %s326_s21 = scalar_lea.vmem %s168_s20, 256  ;;  %p331_p3 = scmp.lt.s32.totalorder %s168_s20, %s168_s20 }
  0xa8   :  { %p327_p2 = scmp.ne.s32.totalorder %s168_s20, %s326_s21  ;;  %p332_p4 = scmp.lt.s32.totalorder %s326_s21, %s326_s21 }
  0xaa   :  { %p333_p5 = por %p332_p4, %p331_p3 }
  0xac   :  { %p334_p6 = pnand %p333_p5, %p327_p2 }
 0x16e   :  { %v240_v36 = vpop.f32.mrb[0].mxu0 }
 0x16f   :  { %v145_v37 = vadd.f32 %v240_v36, %v185_v35  ;;  %v139_v38 = vpop.f32.mrb[1].mxu0 }
 0x170   :  { %v140_v39 = vadd.f32 %v185_v35, %v139_v38 }
 0x171   :  { %149 = vst [vmem:[#allocation6 + $0x8] sm:$0xff] %v145_v37 }
 0x172   :  { %148 = vst [vmem:[#allocation6] sm:$0xff] %v140_v39 }
 0x173   :  { %337 = shalt.err (!%p334_p6)
}
 0x174   :  { %s338_s2 = scalar_lea.hbm %s445_s4, 256 }
 0x175   :  { %p339_p7 = scmp.ne.s32.totalorder %s445_s4, %s338_s2  ;;  %p342_p8 = scmp.lt.u32.totalorder %s338_s2, %s445_s4 }
 0x177   :  { %p344_p9 = pnand %p342_p8, %p339_p7 }
 0x179   :  { %347 = shalt.err (!%p344_p9)
}
 0x17a   :  { %173 = dma.vmem_to_hbm [thread:$0]  %s168_s20, 256, %s445_s4, [#allocation7], %s355_s25, %s355_s25, %s356_s26  }
 0x17b   :  { %350 = dma.done.wait [#allocation4], 256  }
 0x17c   :  { %351 = vsyncadd [#allocation4], 4294967040 }
 0x17d   :  { %352 = dma.done.wait [#allocation7], 256  }
 0x17e   :  { %353 = vsyncadd [#allocation7], 4294967040 }
 0x17f   :  { %180 = vsyncpa [#allocation3], 1 }
 0x180   :  { %181 = vsyncpa [#allocation4], 1 }
 0x181   :  { %182 = vsyncpa [#allocation7], 1 }

</bundles_post_ra>
